<compile_context>
chip_gen: v7x
topology: tpu7x:2x2x1
jax: 0.10.0
libtpu: 0.0.40
codegen_flags: <defaults>
</compile_context>

<pallas_src>
import functools

import jax
import jax.numpy as jnp
from jax.experimental import pallas as pl
from jax.experimental.pallas import tpu as pltpu


def _round_up(x, m):
    return ((x + m - 1) // m) * m


def _vmem_cap_bytes():
    # ~75% of physical per-core VMEM: ~48 MiB on v7x (64 MiB phys),
    # ~96 MiB on v5e/v6e (128 MiB phys).  Fallback if the query is unavailable.
    try:
        return int(pltpu.get_tpu_info().vmem_capacity_bytes) * 3 // 4
    except Exception:
        return 48 << 20


# ---------------------------------------------------------------------------
# Kernel
# ---------------------------------------------------------------------------
def _vae_kernel(
    x_ref, eps_ref,
    w1_ref, b1_ref,           # encoder hidden          (Dp, Hp) bf16 / (1, Hp) f32
    wmv_ref, bmv_ref,         # fused mean|logvar head  (Hp, 2*Zp) bf16 / (1, 2*Zp) f32
    wd1_ref, bd1_ref,         # decoder hidden          (Zp, Hp) bf16 / (1, Hp) f32
    wd2_ref, bd2_ref,         # decoder output          (Hp, Dp) bf16 / (1, Dp) f32
    recon_ref, mean_ref, logvar_ref,
    *, z_pad,
):
    # x arrives as f32 straight from HBM; cast to bf16 in-register for the MXU
    # (avoids a separate cast+pad XLA pass over x before the kernel).
    x = x_ref[...].astype(jnp.bfloat16)

    # --- Encoder hidden: (TB, Dp) x (Dp, Hp) -> f32 ---
    h = jnp.dot(x, w1_ref[...], preferred_element_type=jnp.float32)
    h = jnp.maximum(h + b1_ref[...], 0.0)

    # --- Fused mean | log_var head: one matmul, lane-dense 2*Zp output ---
    head = jnp.dot(h.astype(jnp.bfloat16), wmv_ref[...],
                   preferred_element_type=jnp.float32) + bmv_ref[...]
    mean = head[:, :z_pad]
    log_var = head[:, z_pad:]

    # --- Reparameterization trick: z = mean + exp(0.5*log_var) * eps (f32) ---
    z = mean + jnp.exp(log_var * 0.5) * eps_ref[...]   # bf16 eps promotes to f32

    # --- Decoder ---
    hd = jnp.dot(z.astype(jnp.bfloat16), wd1_ref[...],
                 preferred_element_type=jnp.float32)
    hd = jnp.maximum(hd + bd1_ref[...], 0.0)
    logits = jnp.dot(hd.astype(jnp.bfloat16), wd2_ref[...],
                     preferred_element_type=jnp.float32) + bd2_ref[...]

    recon_ref[...] = jax.nn.sigmoid(logits).astype(recon_ref.dtype)  # bf16 store
    mean_ref[...] = mean
    logvar_ref[...] = log_var


# ---------------------------------------------------------------------------
# Wrapper
# ---------------------------------------------------------------------------
@functools.partial(jax.jit, static_argnames=("img_hw", "block_b"))
def vae_forward(x_nchw, eps, padded_params, *, img_hw, block_b=2048):
    """x_nchw: (B, 1, H, W) f32, eps: (B, z_dim) f32, padded_params: prepare_params().

    Returns (reconstruction (B,1,H,W) bf16, mean (B,z_dim) f32, log_var (B,z_dim) f32).
    """
    B = x_nchw.shape[0]
    H, W = img_hw
    D = H * W
    Z = eps.shape[-1]

    pp = padded_params
    Dp, Hp = pp["w1"].shape
    Zp = pp["wd1"].shape[0]

    # Batch tile: large enough to amortize per-step pipeline overhead (~0.35us)
    # and give long DMA bursts, but capped at ceil(B/2) so large batches always
    # yield >= 2 grid steps (v7x megacore).  Multiple of 16 for bf16 sublanes.
    TB = max(16, min(block_b, _round_up((B + 1) // 2, 16)))
    B_pad = _round_up(B, TB)
    num_tiles = B_pad // TB

    # Keep x in f32 (cast happens in-kernel); skip padding when already aligned.
    x_flat = x_nchw.reshape(B, D)
    if (B_pad, Dp) != (B, D):
        x_p = jnp.pad(x_flat, ((0, B_pad - B), (0, Dp - D)))
    else:
        x_p = x_flat

    eps_b = eps.astype(jnp.bfloat16)
    if (B_pad, Zp) != (B, Z):
        eps_p = jnp.pad(eps_b, ((0, B_pad - B), (0, Zp - Z)))
    else:
        eps_p = eps_b

    # VMEM budget: resident weights + double-buffered streamed tiles + f32 temps.
    bytes_w = 2 * (Dp * Hp + Hp * 2 * Zp + Zp * Hp + Hp * Dp) \
        + 4 * (Hp + 2 * Zp + Hp + Dp)
    bytes_io = 2 * (TB * Dp * 4        # x f32 in
                    + TB * Zp * 2      # eps bf16 in
                    + TB * Dp * 2      # recon bf16 out
                    + 2 * TB * Zp * 4)  # mean + logvar f32 out
    bytes_tmp = 4 * TB * (Dp + Hp + 2 * Zp + Zp + Hp + Dp)
    vmem_limit = int(min(max(2 * (bytes_w + bytes_io + bytes_tmp), 32 << 20),
                         _vmem_cap_bytes()))

    x_spec = pl.BlockSpec((TB, Dp), lambda i: (i, 0))
    eps_spec = pl.BlockSpec((TB, Zp), lambda i: (i, 0))

    def wspec(arr):
        # Weight-style spec: same block every grid step -> stays resident.
        return pl.BlockSpec(arr.shape, lambda i: (0, 0))

    in_specs = [
        x_spec, eps_spec,
        wspec(pp["w1"]), wspec(pp["b1"]),
        wspec(pp["wmv"]), wspec(pp["bmv"]),
        wspec(pp["wd1"]), wspec(pp["bd1"]),
        wspec(pp["wd2"]), wspec(pp["bd2"]),
    ]
    out_specs = (
        pl.BlockSpec((TB, Dp), lambda i: (i, 0)),
        pl.BlockSpec((TB, Zp), lambda i: (i, 0)),
        pl.BlockSpec((TB, Zp), lambda i: (i, 0)),
    )

    recon_p, mean_p, logvar_p = pl.pallas_call(
        functools.partial(_vae_kernel, z_pad=Zp),
        grid=(num_tiles,),
        in_specs=in_specs,
        out_specs=out_specs,
        out_shape=(
            jax.ShapeDtypeStruct((B_pad, Dp), jnp.bfloat16),
            jax.ShapeDtypeStruct((B_pad, Zp), jnp.float32),
            jax.ShapeDtypeStruct((B_pad, Zp), jnp.float32),
        ),
        compiler_params=pltpu.CompilerParams(
            dimension_semantics=("parallel",),
            vmem_limit_bytes=vmem_limit,
        ),
    )(
        x_p, eps_p,
        pp["w1"], pp["b1"],
        pp["wmv"], pp["bmv"],
        pp["wd1"], pp["bd1"],
        pp["wd2"], pp["bd2"],
    )

    reconstruction = recon_p[:B, :D].reshape(B, 1, H, W)
    mean = mean_p[:B, :Z]
    log_var = logvar_p[:B, :Z]
    return reconstruction, mean, log_var


# ---------------------------------------------------------------------------
# Parameter construction / padding
# ---------------------------------------------------------------------------
def init_params(key, d_in, hidden, z_dim):
    """Unpadded f32 MLP-VAE parameters (same shapes as the PyTorch Linear layers)."""
    ks = jax.random.split(key, 10)

    def lin(kw, kb, fan_in, fan_out):
        scale = 1.0 / jnp.sqrt(fan_in)
        w = jax.random.uniform(kw, (fan_in, fan_out), jnp.float32, -scale, scale)
        b = jax.random.uniform(kb, (1, fan_out), jnp.float32, -scale, scale)
        return w, b

    w1, b1 = lin(ks[0], ks[1], d_in, hidden)
    wm, bm = lin(ks[2], ks[3], hidden, z_dim)
    wv, bv = lin(ks[4], ks[5], hidden, z_dim)
    wd1, bd1 = lin(ks[6], ks[7], z_dim, hidden)
    wd2, bd2 = lin(ks[8], ks[9], hidden, d_in)
    return dict(w1=w1, b1=b1, wm=wm, bm=bm, wv=wv, bv=bv,
                wd1=wd1, bd1=bd1, wd2=wd2, bd2=bd2)


def prepare_params(params, d_in, hidden, z_dim):
    """Pad to (8,128)-aligned shapes, fuse mean|log_var head, cast weights to bf16."""
    Dp = _round_up(d_in, 128)
    Hp = _round_up(hidden, 128)
    Zp = _round_up(max(z_dim, 1), 128)

    def pad2(a, r, c):
        return jnp.pad(a, ((0, r - a.shape[0]), (0, c - a.shape[1])))

    w1 = pad2(params["w1"], Dp, Hp).astype(jnp.bfloat16)
    b1 = pad2(params["b1"], 1, Hp).astype(jnp.float32)

    # Fused head: columns [0:z_dim] = mean weights, [Zp:Zp+z_dim] = log_var weights.
    wmv = jnp.zeros((Hp, 2 * Zp), jnp.float32)
    wmv = wmv.at[:hidden, :z_dim].set(params["wm"])
    wmv = wmv.at[:hidden, Zp:Zp + z_dim].set(params["wv"])
    bmv = jnp.zeros((1, 2 * Zp), jnp.float32)
    bmv = bmv.at[:, :z_dim].set(params["bm"])
    bmv = bmv.at[:, Zp:Zp + z_dim].set(params["bv"])

    wd1 = pad2(params["wd1"], Zp, Hp).astype(jnp.bfloat16)
    bd1 = pad2(params["bd1"], 1, Hp).astype(jnp.float32)
    wd2 = pad2(params["wd2"], Hp, Dp).astype(jnp.bfloat16)
    bd2 = pad2(params["bd2"], 1, Dp).astype(jnp.float32)

    return dict(w1=w1, b1=b1, wmv=wmv.astype(jnp.bfloat16), bmv=bmv,
                wd1=wd1, bd1=bd1, wd2=wd2, bd2=bd2)


# ---------------------------------------------------------------------------
# References (for correctness checks)
# ---------------------------------------------------------------------------
def _mirror_reference(x_nchw, eps, pp, d_in, z_dim):
    """Plain-JAX reference mirroring the kernel numerics (bf16 matmuls, bf16 eps/recon)."""
    B = x_nchw.shape[0]
    Dp, Hp = pp["w1"].shape
    Zp = pp["wd1"].shape[0]
    x = jnp.pad(x_nchw.reshape(B, d_in), ((0, 0), (0, Dp - d_in))).astype(jnp.bfloat16)
    ep = jnp.pad(eps, ((0, 0), (0, Zp - z_dim))).astype(jnp.bfloat16)
    h = jnp.maximum(jnp.dot(x, pp["w1"], preferred_element_type=jnp.float32)
                    + pp["b1"], 0.0)
    head = jnp.dot(h.astype(jnp.bfloat16), pp["wmv"],
                   preferred_element_type=jnp.float32) + pp["bmv"]
    mean, log_var = head[:, :Zp], head[:, Zp:]
    z = mean + jnp.exp(0.5 * log_var) * ep
    hd = jnp.maximum(jnp.dot(z.astype(jnp.bfloat16), pp["wd1"],
                             preferred_element_type=jnp.float32) + pp["bd1"], 0.0)
    logits = jnp.dot(hd.astype(jnp.bfloat16), pp["wd2"],
                     preferred_element_type=jnp.float32) + pp["bd2"]
    recon = jax.nn.sigmoid(logits).astype(jnp.bfloat16).astype(jnp.float32)
    return recon[:, :d_in], mean[:, :z_dim], log_var[:, :z_dim]


def _f32_reference(x_nchw, eps, raw):
    """Full-precision unpadded reference (matches the PyTorch module math)."""
    B = x_nchw.shape[0]
    x_flat = x_nchw.reshape(B, -1)
    h = jnp.maximum(x_flat @ raw["w1"] + raw["b1"], 0.0)
    mean = h @ raw["wm"] + raw["bm"]
    log_var = h @ raw["wv"] + raw["bv"]
    z = mean + jnp.exp(0.5 * log_var) * eps
    hd = jnp.maximum(z @ raw["wd1"] + raw["bd1"], 0.0)
    recon = jax.nn.sigmoid(hd @ raw["wd2"] + raw["bd2"])
    return recon, mean, log_var


# ---------------------------------------------------------------------------
# Demo / self-check
# ---------------------------------------------------------------------------
if __name__ == "__main__":
    B, H, W = 2, 16, 16
    HIDDEN, Z_DIM = 32, 2
    D = H * W

    key = jax.random.PRNGKey(0)
    k_x, k_eps, k_params = jax.random.split(key, 3)

    x = jax.random.uniform(k_x, (B, 1, H, W), jnp.float32)        # input images
    eps = jax.random.normal(k_eps, (B, Z_DIM), jnp.float32)       # reparam noise
    raw_params = init_params(k_params, D, HIDDEN, Z_DIM)
    padded_params = prepare_params(raw_params, D, HIDDEN, Z_DIM)

    recon, mean, log_var = vae_forward(x, eps, padded_params, img_hw=(H, W))
    jax.block_until_ready((recon, mean, log_var))

    assert recon.shape == (B, 1, H, W)
    assert mean.shape == (B, Z_DIM)
    assert log_var.shape == (B, Z_DIM)

    recon_f32 = recon.astype(jnp.float32).reshape(B, D)

    # Check 1: exact-numerics mirror (same bf16 padded params / eps, plain JAX).
    r_m, m_m, lv_m = _mirror_reference(x, eps, padded_params, D, Z_DIM)
    assert jnp.allclose(recon_f32, r_m, atol=5e-3), "recon vs mirror"
    assert jnp.allclose(mean, m_m, atol=5e-3), "mean vs mirror"
    assert jnp.allclose(log_var, lv_m, atol=5e-3), "log_var vs mirror"

    # Check 2: full f32 reference (unpadded params); loose tol covers bf16 quantization.
    r_f, m_f, lv_f = _f32_reference(x, eps, raw_params)
    assert jnp.allclose(recon_f32, r_f, atol=5e-2), "recon vs f32 ref"
    assert jnp.allclose(mean, m_f, atol=5e-2), "mean vs f32 ref"
    assert jnp.allclose(log_var, lv_f, atol=5e-2), "log_var vs f32 ref"

    print("KERNEL_OK")
</pallas_src>

<mosaic_0001>
module attributes {stable_mosaic.version = 11 : i64} {
  func.func @_vae_kernel(%arg0: i32, %arg1: memref<16x256xf32, #tpu.memory_space<vmem>>, %arg2: memref<16x128xbf16, #tpu.memory_space<vmem>>, %arg3: memref<256x128xbf16, #tpu.memory_space<vmem>>, %arg4: memref<1x128xf32, #tpu.memory_space<vmem>>, %arg5: memref<128x256xbf16, #tpu.memory_space<vmem>>, %arg6: memref<1x256xf32, #tpu.memory_space<vmem>>, %arg7: memref<128x128xbf16, #tpu.memory_space<vmem>>, %arg8: memref<1x128xf32, #tpu.memory_space<vmem>>, %arg9: memref<128x256xbf16, #tpu.memory_space<vmem>>, %arg10: memref<1x256xf32, #tpu.memory_space<vmem>>, %arg11: memref<16x256xbf16, #tpu.memory_space<vmem>>, %arg12: memref<16x128xf32, #tpu.memory_space<vmem>>, %arg13: memref<16x128xf32, #tpu.memory_space<vmem>>) attributes {dimension_semantics = [#tpu.dimension_semantics<parallel>], iteration_bounds = array<i64: 1>, scalar_prefetch = 0 : i64, scratch_operands = 0 : i64, tpu.core_type = #tpu.core_type<tc>, window_params = [{transform_indices = @transform_0, window_bounds = array<i64: 16, 256>}, {transform_indices = @transform_1, window_bounds = array<i64: 16, 128>}, {pipeline_mode = #tpu.pipeline_mode<synchronous>, transform_indices = @transform_2, window_bounds = array<i64: 256, 128>}, {pipeline_mode = #tpu.pipeline_mode<synchronous>, transform_indices = @transform_3, window_bounds = array<i64: 1, 128>}, {pipeline_mode = #tpu.pipeline_mode<synchronous>, transform_indices = @transform_4, window_bounds = array<i64: 128, 256>}, {pipeline_mode = #tpu.pipeline_mode<synchronous>, transform_indices = @transform_5, window_bounds = array<i64: 1, 256>}, {pipeline_mode = #tpu.pipeline_mode<synchronous>, transform_indices = @transform_6, window_bounds = array<i64: 128, 128>}, {pipeline_mode = #tpu.pipeline_mode<synchronous>, transform_indices = @transform_7, window_bounds = array<i64: 1, 128>}, {pipeline_mode = #tpu.pipeline_mode<synchronous>, transform_indices = @transform_8, window_bounds = array<i64: 128, 256>}, {pipeline_mode = #tpu.pipeline_mode<synchronous>, transform_indices = @transform_9, window_bounds = array<i64: 1, 256>}, {transform_indices = @transform_10, window_bounds = array<i64: 16, 256>}, {transform_indices = @transform_11, window_bounds = array<i64: 16, 128>}, {transform_indices = @transform_12, window_bounds = array<i64: 16, 128>}]} {
    %c0 = arith.constant 0 : index
    %c0_0 = arith.constant 0 : index
    %0 = vector.load %arg1[%c0, %c0_0] : memref<16x256xf32, #tpu.memory_space<vmem>>, vector<16x256xf32>
    %1 = arith.truncf %0 : vector<16x256xf32> to vector<16x256xbf16>
    %c0_1 = arith.constant 0 : index
    %c0_2 = arith.constant 0 : index
    %2 = vector.load %arg3[%c0_1, %c0_2] : memref<256x128xbf16, #tpu.memory_space<vmem>>, vector<256x128xbf16>
    %cst = arith.constant dense<0.000000e+00> : vector<16x128xf32>
    %3 = tpu.matmul %1, %2, %cst {dimension_numbers = #tpu.dot_dimension_numbers<[1], [0], [0], [1], [0, 0, 1, 1], [], []>} : vector<16x256xbf16>, vector<256x128xbf16>, vector<16x128xf32> -> vector<16x128xf32>
    %c0_3 = arith.constant 0 : index
    %c0_4 = arith.constant 0 : index
    %4 = vector.load %arg4[%c0_3, %c0_4] : memref<1x128xf32, #tpu.memory_space<vmem>>, vector<1x128xf32>
    %5 = vector.broadcast %4 : vector<1x128xf32> to vector<16x128xf32>
    %6 = arith.addf %3, %5 : vector<16x128xf32>
    %cst_5 = arith.constant 0.000000e+00 : f32
    %7 = vector.broadcast %cst_5 : f32 to vector<16x128xf32>
    %8 = arith.maximumf %6, %7 : vector<16x128xf32>
    %9 = arith.truncf %8 : vector<16x128xf32> to vector<16x128xbf16>
    %c0_6 = arith.constant 0 : index
    %c0_7 = arith.constant 0 : index
    %10 = vector.load %arg5[%c0_6, %c0_7] : memref<128x256xbf16, #tpu.memory_space<vmem>>, vector<128x256xbf16>
    %cst_8 = arith.constant dense<0.000000e+00> : vector<16x256xf32>
    %11 = tpu.matmul %9, %10, %cst_8 {dimension_numbers = #tpu.dot_dimension_numbers<[1], [0], [0], [1], [0, 0, 1, 1], [], []>} : vector<16x128xbf16>, vector<128x256xbf16>, vector<16x256xf32> -> vector<16x256xf32>
    %c0_9 = arith.constant 0 : index
    %c0_10 = arith.constant 0 : index
    %12 = vector.load %arg6[%c0_9, %c0_10] : memref<1x256xf32, #tpu.memory_space<vmem>>, vector<1x256xf32>
    %13 = vector.broadcast %12 : vector<1x256xf32> to vector<16x256xf32>
    %14 = arith.addf %11, %13 : vector<16x256xf32>
    %15 = vector.extract_strided_slice %14 {offsets = [0, 0], sizes = [16, 128], strides = [1, 1]} : vector<16x256xf32> to vector<16x128xf32>
    %16 = vector.extract_strided_slice %14 {offsets = [0, 128], sizes = [16, 128], strides = [1, 1]} : vector<16x256xf32> to vector<16x128xf32>
    %cst_11 = arith.constant 5.000000e-01 : f32
    %17 = vector.broadcast %cst_11 : f32 to vector<16x128xf32>
    %18 = arith.mulf %16, %17 : vector<16x128xf32>
    %19 = math.exp %18 : vector<16x128xf32>
    %c0_12 = arith.constant 0 : index
    %c0_13 = arith.constant 0 : index
    %20 = vector.load %arg2[%c0_12, %c0_13] : memref<16x128xbf16, #tpu.memory_space<vmem>>, vector<16x128xbf16>
    %21 = arith.extf %20 : vector<16x128xbf16> to vector<16x128xf32>
    %22 = arith.mulf %19, %21 : vector<16x128xf32>
    %23 = arith.addf %15, %22 : vector<16x128xf32>
    %24 = arith.truncf %23 : vector<16x128xf32> to vector<16x128xbf16>
    %c0_14 = arith.constant 0 : index
    %c0_15 = arith.constant 0 : index
    %25 = vector.load %arg7[%c0_14, %c0_15] : memref<128x128xbf16, #tpu.memory_space<vmem>>, vector<128x128xbf16>
    %cst_16 = arith.constant dense<0.000000e+00> : vector<16x128xf32>
    %26 = tpu.matmul %24, %25, %cst_16 {dimension_numbers = #tpu.dot_dimension_numbers<[1], [0], [0], [1], [0, 0, 1, 1], [], []>} : vector<16x128xbf16>, vector<128x128xbf16>, vector<16x128xf32> -> vector<16x128xf32>
    %c0_17 = arith.constant 0 : index
    %c0_18 = arith.constant 0 : index
    %27 = vector.load %arg8[%c0_17, %c0_18] : memref<1x128xf32, #tpu.memory_space<vmem>>, vector<1x128xf32>
    %28 = vector.broadcast %27 : vector<1x128xf32> to vector<16x128xf32>
    %29 = arith.addf %26, %28 : vector<16x128xf32>
    %cst_19 = arith.constant 0.000000e+00 : f32
    %30 = vector.broadcast %cst_19 : f32 to vector<16x128xf32>
    %31 = arith.maximumf %29, %30 : vector<16x128xf32>
    %32 = arith.truncf %31 : vector<16x128xf32> to vector<16x128xbf16>
    %c0_20 = arith.constant 0 : index
    %c0_21 = arith.constant 0 : index
    %33 = vector.load %arg9[%c0_20, %c0_21] : memref<128x256xbf16, #tpu.memory_space<vmem>>, vector<128x256xbf16>
    %cst_22 = arith.constant dense<0.000000e+00> : vector<16x256xf32>
    %34 = tpu.matmul %32, %33, %cst_22 {dimension_numbers = #tpu.dot_dimension_numbers<[1], [0], [0], [1], [0, 0, 1, 1], [], []>} : vector<16x128xbf16>, vector<128x256xbf16>, vector<16x256xf32> -> vector<16x256xf32>
    %c0_23 = arith.constant 0 : index
    %c0_24 = arith.constant 0 : index
    %35 = vector.load %arg10[%c0_23, %c0_24] : memref<1x256xf32, #tpu.memory_space<vmem>>, vector<1x256xf32>
    %36 = vector.broadcast %35 : vector<1x256xf32> to vector<16x256xf32>
    %37 = arith.addf %34, %36 : vector<16x256xf32>
    %38 = arith.negf %37 : vector<16x256xf32>
    %39 = math.exp %38 : vector<16x256xf32>
    %cst_25 = arith.constant 1.000000e+00 : f32
    %40 = vector.broadcast %cst_25 : f32 to vector<16x256xf32>
    %41 = arith.addf %40, %39 : vector<16x256xf32>
    %42 = arith.divf %40, %41 : vector<16x256xf32>
    %43 = arith.truncf %42 : vector<16x256xf32> to vector<16x256xbf16>
    %c0_26 = arith.constant 0 : index
    %c0_27 = arith.constant 0 : index
    %44 = vector.load %arg11[%c0_26, %c0_27] : memref<16x256xbf16, #tpu.memory_space<vmem>>, vector<16x256xbf16>
    tpu.vector_store %arg11[%c0_26, %c0_27], %43 {strides = array<i32>} : memref<16x256xbf16, #tpu.memory_space<vmem>>, vector<16x256xbf16>,
    %c0_28 = arith.constant 0 : index
    %c0_29 = arith.constant 0 : index
    %45 = vector.load %arg12[%c0_28, %c0_29] : memref<16x128xf32, #tpu.memory_space<vmem>>, vector<16x128xf32>
    tpu.vector_store %arg12[%c0_28, %c0_29], %15 {strides = array<i32>} : memref<16x128xf32, #tpu.memory_space<vmem>>, vector<16x128xf32>,
    %c0_30 = arith.constant 0 : index
    %c0_31 = arith.constant 0 : index
    %46 = vector.load %arg13[%c0_30, %c0_31] : memref<16x128xf32, #tpu.memory_space<vmem>>, vector<16x128xf32>
    tpu.vector_store %arg13[%c0_30, %c0_31], %16 {strides = array<i32>} : memref<16x128xf32, #tpu.memory_space<vmem>>, vector<16x128xf32>,
    return
  }
  func.func @transform_0(%arg0: i32) -> (i32, i32) {
    %c0_i32 = arith.constant 0 : i32
    %c0_i32_0 = arith.constant 0 : i32
    return %arg0, %c0_i32 : i32, i32
  }
  func.func @transform_1(%arg0: i32) -> (i32, i32) {
    %c0_i32 = arith.constant 0 : i32
    %c0_i32_0 = arith.constant 0 : i32
    return %arg0, %c0_i32 : i32, i32
  }
  func.func @transform_2(%arg0: i32) -> (i32, i32) {
    %c0_i32 = arith.constant 0 : i32
    %c0_i32_0 = arith.constant 0 : i32
    %c0_i32_1 = arith.constant 0 : i32
    return %c0_i32, %c0_i32_0 : i32, i32
  }
  func.func @transform_3(%arg0: i32) -> (i32, i32) {
    %c0_i32 = arith.constant 0 : i32
    %c0_i32_0 = arith.constant 0 : i32
    %c0_i32_1 = arith.constant 0 : i32
    return %c0_i32, %c0_i32_0 : i32, i32
  }
  func.func @transform_4(%arg0: i32) -> (i32, i32) {
    %c0_i32 = arith.constant 0 : i32
    %c0_i32_0 = arith.constant 0 : i32
    %c0_i32_1 = arith.constant 0 : i32
    return %c0_i32, %c0_i32_0 : i32, i32
  }
  func.func @transform_5(%arg0: i32) -> (i32, i32) {
    %c0_i32 = arith.constant 0 : i32
    %c0_i32_0 = arith.constant 0 : i32
    %c0_i32_1 = arith.constant 0 : i32
    return %c0_i32, %c0_i32_0 : i32, i32
  }
  func.func @transform_6(%arg0: i32) -> (i32, i32) {
    %c0_i32 = arith.constant 0 : i32
    %c0_i32_0 = arith.constant 0 : i32
    %c0_i32_1 = arith.constant 0 : i32
    return %c0_i32, %c0_i32_0 : i32, i32
  }
  func.func @transform_7(%arg0: i32) -> (i32, i32) {
    %c0_i32 = arith.constant 0 : i32
    %c0_i32_0 = arith.constant 0 : i32
    %c0_i32_1 = arith.constant 0 : i32
    return %c0_i32, %c0_i32_0 : i32, i32
  }
  func.func @transform_8(%arg0: i32) -> (i32, i32) {
    %c0_i32 = arith.constant 0 : i32
    %c0_i32_0 = arith.constant 0 : i32
    %c0_i32_1 = arith.constant 0 : i32
    return %c0_i32, %c0_i32_0 : i32, i32
  }
  func.func @transform_9(%arg0: i32) -> (i32, i32) {
    %c0_i32 = arith.constant 0 : i32
    %c0_i32_0 = arith.constant 0 : i32
    %c0_i32_1 = arith.constant 0 : i32
    return %c0_i32, %c0_i32_0 : i32, i32
  }
  func.func @transform_10(%arg0: i32) -> (i32, i32) {
    %c0_i32 = arith.constant 0 : i32
    %c0_i32_0 = arith.constant 0 : i32
    return %arg0, %c0_i32 : i32, i32
  }
  func.func @transform_11(%arg0: i32) -> (i32, i32) {
    %c0_i32 = arith.constant 0 : i32
    %c0_i32_0 = arith.constant 0 : i32
    return %arg0, %c0_i32 : i32, i32
  }
  func.func @transform_12(%arg0: i32) -> (i32, i32) {
    %c0_i32 = arith.constant 0 : i32
    %c0_i32_0 = arith.constant 0 : i32
    return %arg0, %c0_i32 : i32, i32
  }
}

</mosaic_0001>

<bundles_post_ra>
// kernel: vae_forward.1
= control target key start
LH: loop header
LB: loop body
LE: loop exit
PB: predicated region body
PF: predicated region fallthrough
CT: control target
= control target key end

     0   :  { %18 = vsyncpa [#allocation3], 0  ;;  %s1232_s0 = inlined_call_operand.vmem [shape: f32[16,256], index: 0, kind: input, shape index: {}]   ;;  %s1233_s1 = inlined_call_operand.vmem [shape: bf16[16,128], index: 1, kind: input, shape index: {}]   ;;  %s1234_s2 = inlined_call_operand.hbm [shape: bf16[256,128], index: 2, kind: input, shape index: {}]   ;;  %s1235_s3 = inlined_call_operand.vmem [shape: f32[1,128], index: 3, kind: input, shape index: {}]   ;;  %s1236_s4 = inlined_call_operand.hbm [shape: bf16[128,256], index: 4, kind: input, shape index: {}]   ;;  %s1237_s5 = inlined_call_operand.vmem [shape: f32[1,256], index: 5, kind: input, shape index: {}]   ;;  %s1238_s6 = inlined_call_operand.vmem [shape: bf16[128,128], index: 6, kind: input, shape index: {}]   ;;  %s1239_s7 = inlined_call_operand.vmem [shape: f32[1,128], index: 7, kind: input, shape index: {}]   ;;  %s1240_s8 = inlined_call_operand.hbm [shape: bf16[128,256], index: 8, kind: input, shape index: {}]   ;;  %s1241_s9 = inlined_call_operand.vmem [shape: f32[1,256], index: 9, kind: input, shape index: {}]   ;;  %s1242_s10 = inlined_call_operand.vmem [shape: bf16[16,256], index: 10, kind: output, shape index: {0}]   ;;  %s1243_s11 = inlined_call_operand.vmem [shape: f32[16,128], index: 11, kind: output, shape index: {1}]   ;;  %s1244_s12 = inlined_call_operand.vmem [shape: f32[16,128], index: 12, kind: output, shape index: {2}]  }
   0x1   :  { %19 = vsyncpa [#allocation5], 0  ;;  %s1046_s21 = smov [#allocation4]   ;;  %s976_s25 = scalar_lea.hbm %s1236_s4, 2048 }
   0x2   :  { %s43_s22 = sshll.u32 %s1046_s21, 4  ;;  %p977_p0 = scmp.ne.s32.totalorder %s1236_s4, %s976_s25  ;;  %s44_s22 = int_to_ptr.vmem [resolvable:$true] %s43_s22 }
   0x3   :  { %p980_p1 = scmp.lt.u32.totalorder %s976_s25, %s1236_s4 }
   0x5   :  { %p982_p2 = pnand %p980_p1, %p977_p0 }
   0x7   :  { %985 = shalt.err (!%p982_p2)
}
   0x8   :  { %s986_s30 = scalar_lea.vmem %s44_s22, 2048  ;;  %p991_p4 = scmp.lt.s32.totalorder %s44_s22, %s44_s22 }
   0x9   :  { %p987_p3 = scmp.ne.s32.totalorder %s44_s22, %s986_s30  ;;  %p992_p5 = scmp.lt.s32.totalorder %s986_s30, %s986_s30 }
   0xb   :  { %p993_p6 = por %p992_p5, %p991_p4 }
   0xd   :  { %p994_p7 = pnand %p993_p6, %p987_p3 }
   0xf   :  { %997 = shalt.err (!%p994_p7)
}
  0x10   :  { %s1047_s13 = smov 128   ;;  %s1048_s14 = smov 8  }
  0x11   :  { %49 = dma.hbm_to_vmem [thread:$0]  %s1236_s4, 2048, %s44_s22, [#allocation5], %s1047_s13, %s1047_s13, %s1048_s14  }
  0x12   :  { %s1049_s17 = smov [#allocation2]   ;;  %s998_s21 = scalar_lea.hbm %s1234_s2, 2048 }
  0x13   :  { %s29_s18 = sshll.u32 %s1049_s17, 4  ;;  %p999_p8 = scmp.ne.s32.totalorder %s1234_s2, %s998_s21  ;;  %s30_s18 = int_to_ptr.vmem [resolvable:$true] %s29_s18 }
  0x14   :  { %p1002_p9 = scmp.lt.u32.totalorder %s998_s21, %s1234_s2 }
  0x16   :  { %p1004_p10 = pnand %p1002_p9, %p999_p8 }
  0x18   :  { %1007 = shalt.err (!%p1004_p10)
}
  0x19   :  { %s1008_s27 = scalar_lea.vmem %s30_s18, 2048  ;;  %p1013_p12 = scmp.lt.s32.totalorder %s30_s18, %s30_s18 }
  0x1a   :  { %p1009_p11 = scmp.ne.s32.totalorder %s30_s18, %s1008_s27  ;;  %p1014_p13 = scmp.lt.s32.totalorder %s1008_s27, %s1008_s27 }
  0x1c   :  { %p1015_p0 = por %p1014_p13, %p1013_p12 }
  0x1e   :  { %p1016_p1 = pnand %p1015_p0, %p1009_p11 }
  0x20   :  { %1019 = shalt.err (!%p1016_p1)
}
  0x21   :  { %s1050_s4 = smov 64   ;;  %s1051_s22 = smov 4  }
  0x22   :  { %35 = dma.hbm_to_vmem [thread:$0]  %s1234_s2, 2048, %s30_s18, [#allocation3], %s1050_s4, %s1050_s4, %s1051_s22  }
  0x23   :  { %s1052_s30 = smov [#allocation6]   ;;  %s1020_s19 = scalar_lea.hbm %s1240_s8, 2048 }
  0x24   :  { %s61_s15 = sshll.u32 %s1052_s30, 4  ;;  %p1021_p2 = scmp.ne.s32.totalorder %s1240_s8, %s1020_s19  ;;  %s62_s15 = int_to_ptr.vmem [resolvable:$true] %s61_s15 }
  0x25   :  { %p1024_p3 = scmp.lt.u32.totalorder %s1020_s19, %s1240_s8 }
  0x27   :  { %p1026_p4 = pnand %p1024_p3, %p1021_p2 }
  0x29   :  { %1029 = shalt.err (!%p1026_p4)
}
  0x2a   :  { %s1030_s25 = scalar_lea.vmem %s62_s15, 2048  ;;  %p1035_p6 = scmp.lt.s32.totalorder %s62_s15, %s62_s15 }
  0x2b   :  { %p1031_p5 = scmp.ne.s32.totalorder %s62_s15, %s1030_s25  ;;  %p1036_p7 = scmp.lt.s32.totalorder %s1030_s25, %s1030_s25 }
  0x2d   :  { %p1037_p8 = por %p1036_p7, %p1035_p6 }
  0x2f   :  { %p1038_p9 = pnand %p1037_p8, %p1031_p5 }
  0x31   :  { %1041 = shalt.err (!%p1038_p9)
}
  0x32   :  { %67 = dma.hbm_to_vmem [thread:$0]  %s1240_s8, 2048, %s62_s15, [#allocation5], %s1047_s13, %s1047_s13, %s1048_s14  }
  0x33   :  { %1042 = dma.done.wait [#allocation3], 2048  }
  0x34   :  { %1043 = vsyncadd [#allocation3], 4294965248 }
  0x35   :  { %1044 = dma.done.wait [#allocation5], 4096  }
  0x36   :  { %1045 = vsyncadd [#allocation5], 4294963200  ;;  %v884_v0 = vld [vmem:[#allocation2 + $0x40] sm:$0xff]   ;;  %v886_v2 = vld [vmem:[#allocation2 + $0x48] sm:$0xff]   ;;  %v1053_v38 = vmov 0   ;;  %v1054_v40 = vmov 0.0  }
  0x37   :  { %v885_v1 = vld [vmem:[#allocation2] sm:$0xff]   ;;  %823 = vmatprep.subr.bf16.mxu0 %v884_v0  ;;  %v887_v3 = vld [vmem:[#allocation2 + $0x8] sm:$0xff]   ;;  %v888_v4 = vld [vmem:[#allocation2 + $0x50] sm:$0xff]   ;;  %405 = vmatprep.mubr.bf16.mxu1 %v1053_v38  ;;  %vm1055_vm0 = vmmov 0  }
  0x38   :  { %824 = vmatpush3.bf16.msra.mxu0 %v885_v1  ;;  %v889_v5 = vld [vmem:[#allocation2 + $0x10] sm:$0xff]   ;;  %v890_v6 = vld [vmem:[#allocation2 + $0x58] sm:$0xff]   ;;  %v892_v8 = vld [vmem:[#allocation2 + $0x60] sm:$0xff]  }
  0x39   :  { %825 = vmatprep.subr.bf16.mxu0 %v886_v2  ;;  %v891_v7 = vld [vmem:[#allocation2 + $0x18] sm:$0xff]   ;;  %v893_v9 = vld [vmem:[#allocation2 + $0x20] sm:$0xff]   ;;  %v894_v10 = vld [vmem:[#allocation2 + $0x68] sm:$0xff]  }
  0x3a   :  { %v81_v11 = vld [vmem:[%s1232_s0 + $0x8] sm:$0xff]  ;;  %v83_v12 = vld [vmem:[%s1232_s0 + $0x18] sm:$0xff]  ;;  %v896_v18 = vld [vmem:[#allocation2 + $0x70] sm:$0xff]  }
  0x3b   :  { %v85_v13 = vpack.c.bf16 %v83_v12, %v81_v11  ;;  %v900_v14 = vld [vmem:[#allocation4 + $0x4] ss:$8 sps:$4 sm:$0xff]   ;;  %v902_v15 = vld [vmem:[#allocation4] ss:$8 sps:$4 sm:$0xff]   ;;  %v903_v17 = vld [vmem:[#allocation4 + $0x14] ss:$8 sps:$4 sm:$0xff]  }
  0x3c   :  { %826 = vmatpush3.bf16.msra.mxu0 %v887_v3  ;;  %v895_v16 = vld [vmem:[#allocation2 + $0x28] sm:$0xff]   ;;  %373 = vmatprep.subr.bf16.mxu1 %v900_v14  ;;  %v905_v19 = vld [vmem:[#allocation4 + $0x10] ss:$8 sps:$4 sm:$0xff]   ;;  %v909_v24 = vld [vmem:[#allocation4 + $0x34] ss:$8 sps:$4 sm:$0xff]  }
  0x3d   :  { %827 = vmatprep.subr.bf16.mxu0 %v888_v4  ;;  %253 = vmatprep.mubr.bf16.mxu0 %v85_v13  ;;  %v897_v20 = vld [vmem:[#allocation2 + $0x30] sm:$0xff]   ;;  %v906_v21 = vld [vmem:[#allocation4 + $0x24] ss:$8 sps:$4 sm:$0xff]   ;;  %v898_v22 = vld [vmem:[#allocation2 + $0x78] sm:$0xff]  }
  0x3e   :  { %374 = vmatpush1.bf16.msra.mxu1 %v902_v15  ;;  %v908_v23 = vld [vmem:[#allocation4 + $0x20] ss:$8 sps:$4 sm:$0xff]   ;;  %v899_v25 = vld [vmem:[#allocation2 + $0x38] sm:$0xff]   ;;  %v82_v27 = vld [vmem:[%s1232_s0 + $0x10] sm:$0xff] }
  0x3f   :  { %375 = vmatprep.subr.bf16.mxu1 %v903_v17  ;;  %v80_v26 = vld [vmem:[%s1232_s0] sm:$0xff]  ;;  %v911_v28 = vld [vmem:[#allocation4 + $0x30] ss:$8 sps:$4 sm:$0xff]   ;;  %v915_v32 = vld [vmem:[#allocation4 + $0x54] ss:$8 sps:$4 sm:$0xff]  }
  0x40   :  { %828 = vmatpush3.bf16.msra.mxu0 %v889_v5  ;;  %v912_v29 = vld [vmem:[#allocation4 + $0x44] ss:$8 sps:$4 sm:$0xff]   ;;  %v84_v30 = vpack.c.bf16 %v82_v27, %v80_v26  ;;  %v914_v31 = vld [vmem:[#allocation4 + $0x40] ss:$8 sps:$4 sm:$0xff]   ;;  %v917_v33 = vld [vmem:[#allocation4 + $0x50] ss:$8 sps:$4 sm:$0xff]  }
  0x41   :  { %829 = vmatprep.subr.bf16.mxu0 %v890_v6  ;;  %v918_v34 = vld [vmem:[#allocation4 + $0x64] ss:$8 sps:$4 sm:$0xff]   ;;  %v920_v35 = vld [vmem:[#allocation4 + $0x60] ss:$8 sps:$4 sm:$0xff]   ;;  %v921_v36 = vld [vmem:[#allocation4 + $0x74] ss:$8 sps:$4 sm:$0xff]  }
  0x42   :  { %376 = vmatpush1.bf16.msra.mxu1 %v905_v19  ;;  %v923_v37 = vld [vmem:[#allocation4 + $0x70] ss:$8 sps:$4 sm:$0xff]   ;;  %v924_v39 = vld [vmem:[%s1238_s6] sm:$0xff]   ;;  %v925_v53 = vld [vmem:[%s1238_s6 + $0x8] sm:$0xff]  }
  0x43   :  { %377 = vmatprep.subr.bf16.mxu1 %v906_v21  ;;  %v753_v42 = vld [vmem:[%s1235_s3] ss:$0 sm:$0xff]  ;;  %v926_v54 = vld [vmem:[%s1238_s6 + $0x10] sm:$0xff]   ;;  %v927_v55 = vld [vmem:[%s1238_s6 + $0x18] sm:$0xff]  }
  0x44   :  { %830 = vmatpush3.bf16.msra.mxu0 %v891_v7  ;;  %v928_v56 = vld [vmem:[%s1238_s6 + $0x20] sm:$0xff]   ;;  %v929_v57 = vld [vmem:[%s1238_s6 + $0x28] sm:$0xff]   ;;  %v930_v58 = vld [vmem:[%s1238_s6 + $0x30] sm:$0xff]  }
  0x45   :  { %831 = vmatprep.subr.bf16.mxu0 %v892_v8  ;;  %v931_v59 = vld [vmem:[%s1238_s6 + $0x38] sm:$0xff]   ;;  %v932_v60 = vld [vmem:[#allocation6] ss:$8 sps:$4 sm:$0xff]   ;;  %v934_v61 = vld [vmem:[#allocation6 + $0x4] ss:$8 sps:$4 sm:$0xff]   ;;  %v283_v8 = vlaneseq }
  0x46   :  { %378 = vmatpush1.bf16.msra.mxu1 %v908_v23  ;;  %v937_v62 = vld [vmem:[#allocation6 + $0x14] ss:$8 sps:$4 sm:$0xff]   ;;  %v935_v63 = vld [vmem:[#allocation6 + $0x10] ss:$8 sps:$4 sm:$0xff]   ;;  %v940_v0 = vld [vmem:[#allocation6 + $0x24] ss:$8 sps:$4 sm:$0xff]  }
  0x47   :  { %379 = vmatprep.subr.bf16.mxu1 %v909_v24  ;;  %v938_v1 = vld [vmem:[#allocation6 + $0x20] ss:$8 sps:$4 sm:$0xff]   ;;  %v943_v2 = vld [vmem:[#allocation6 + $0x34] ss:$8 sps:$4 sm:$0xff]   ;;  %v941_v3 = vld [vmem:[#allocation6 + $0x30] ss:$8 sps:$4 sm:$0xff]  }
  0x48   :  { %832 = vmatpush3.bf16.msra.mxu0 %v893_v9  ;;  %v946_v4 = vld [vmem:[#allocation6 + $0x44] ss:$8 sps:$4 sm:$0xff]   ;;  %v944_v5 = vld [vmem:[#allocation6 + $0x40] ss:$8 sps:$4 sm:$0xff]   ;;  %v949_v6 = vld [vmem:[#allocation6 + $0x54] ss:$8 sps:$4 sm:$0xff]  }
  0x49   :  { %833 = vmatprep.subr.bf16.mxu0 %v894_v10  ;;  %v947_v7 = vld [vmem:[#allocation6 + $0x50] ss:$8 sps:$4 sm:$0xff]   ;;  %v284_v9 = vshrl.u32 %v283_v8, 7  ;;  %v281_v11 = vld [vmem:[%s1237_s5] sm:$0x3] }
  0x4a   :  { %380 = vmatpush1.bf16.msra.mxu1 %v911_v28  ;;  %v820_v27 = vld [vmem:[%s1233_s1] sm:$0xff]  }
  0x4b   :  { %381 = vmatprep.subr.bf16.mxu1 %v912_v29  ;;  %v285_v10 = vsub.s32 0, %v284_v9  ;;  %v289_v12 = vsub.s32 1, %v284_v9  ;;  %v821_v28 = vunpack.c.l.bf16 %v820_v27  ;;  %v822_v29 = vunpack.c.h.bf16 %v820_v27 }
  0x4c   :  { %834 = vmatpush3.bf16.msra.mxu0 %v895_v16 }
  0x4d   :  { %835 = vmatprep.subr.bf16.mxu0 %v896_v18  ;;  %v286_v13 = vrot.slane %v281_v11, %v285_v10  ;;  %v290_v14 = vrot.slane %v281_v11, %v289_v12 }
  0x4e   :  { %382 = vmatpush1.bf16.msra.mxu1 %v914_v31 }
  0x4f   :  { %383 = vmatprep.subr.bf16.mxu1 %v915_v32 }
  0x50   :  { %836 = vmatpush3.bf16.msra.mxu0 %v897_v20 }
  0x51   :  { %837 = vmatprep.subr.bf16.mxu0 %v898_v22 }
  0x52   :  { %384 = vmatpush1.bf16.msra.mxu1 %v917_v33 }
  0x53   :  { %385 = vmatprep.subr.bf16.mxu1 %v918_v34 }
  0x54   :  { %838 = vmatpush3.bf16.msra.mxu0 %v899_v25 }
  0x55   :  { %854 = vmatprep.subr.bf16.mxu0 %v1054_v40 }
  0x56   :  { %386 = vmatpush1.bf16.msra.mxu1 %v920_v35 }
  0x57   :  { %254 = vmatmul.mubr.bf16.vlgmr.msra.gmra.mrb[0].mxu0 %v84_v30  ;;  %387 = vmatprep.subr.bf16.mxu1 %v921_v36 }
  0x58   :  { %855 = vmatpush3.bf16.msra.mxu0 %v924_v39  ;;  %870 = vmatprep.mubr.msk.bf16.mxu0 %vm1055_vm0, %v1054_v40  ;;  %v955_v39 = vld [vmem:[#allocation6 + $0x74] ss:$8 sps:$4 sm:$0xff]  }
  0x59   :  { %856 = vmatprep.subr.bf16.mxu0 %v1054_v40 }
  0x5a   :  { %388 = vmatpush1.bf16.msra.mxu1 %v923_v37  ;;  %v952_v37 = vld [vmem:[#allocation6 + $0x64] ss:$8 sps:$4 sm:$0xff]  }
  0x5b   :  { %654 = vmatprep.subr.bf16.mxu1 %v934_v61 }
  0x5c   :  { %857 = vmatpush3.bf16.msra.mxu0 %v925_v53 }
  0x5d   :  { %858 = vmatprep.subr.bf16.mxu0 %v1054_v40 }
  0x60   :  { %859 = vmatpush3.bf16.msra.mxu0 %v926_v54 }
  0x61   :  { %860 = vmatprep.subr.bf16.mxu0 %v1054_v40 }
  0x64   :  { %861 = vmatpush3.bf16.msra.mxu0 %v927_v55 }
  0x65   :  { %862 = vmatprep.subr.bf16.mxu0 %v1054_v40 }
  0x68   :  { %863 = vmatpush3.bf16.msra.mxu0 %v928_v56 }
  0x69   :  { %864 = vmatprep.subr.bf16.mxu0 %v1054_v40 }
  0x6c   :  { %865 = vmatpush3.bf16.msra.mxu0 %v929_v57 }
  0x6d   :  { %866 = vmatprep.subr.bf16.mxu0 %v1054_v40 }
  0x70   :  { %867 = vmatpush3.bf16.msra.mxu0 %v930_v58 }
  0x71   :  { %868 = vmatprep.subr.bf16.mxu0 %v1054_v40  ;;  %v953_v40 = vld [vmem:[#allocation6 + $0x70] ss:$8 sps:$4 sm:$0xff]  }
  0x74   :  { %869 = vmatpush3.bf16.msra.mxu0 %v931_v59 }
 0x12a   :  { %v839_v41 = vpop.f32.mrb[0].mxu0 }
 0x12b   :  { %v840_v43 = vpop.f32.mrb[1].mxu0 }
 0x12c   :  { %v841_v44 = vadd.f32 %v840_v43, %v839_v41  ;;  %v842_v45 = vpop.f32.mrb[2].mxu0  ;;  %v786_v41 = vld [vmem:[%s1239_s7] ss:$0 sm:$0xff] }
 0x12d   :  { %v843_v46 = vpop.f32.mrb[3].mxu0 }
 0x12e   :  { %v256_v47 = vadd.f32 %v841_v44, %v753_v42  ;;  %v844_v48 = vadd.f32 %v843_v46, %v842_v45 }
 0x130   :  { %v259_v49 = vadd.f32 %v844_v48, %v753_v42  ;;  %v262_v50 = vmax.f32 %v256_v47, 0.0 }
 0x132   :  { %v263_v51 = vmax.f32 %v259_v49, 0.0 }
 0x134   :  { %v264_v52 = vpack.c.bf16 %v263_v51, %v262_v50  ;;  %v562_v51 = vld [vmem:[%s1241_s9] sm:$0x3] }
 0x135   :  { %v571_v53 = vrot.slane %v562_v51, %v289_v12 }
 0x136   :  { %406 = vmatmul.mubr.bf16.vlgmr.msra.gmra.mrb[0].mxu1 %v264_v52  ;;  %v567_v52 = vrot.slane %v562_v51, %v285_v10 }
 0x137   :  { %686 = vmatprep.mubr.bf16.mxu1 %v1053_v38  ;;  %655 = vmatpush1.bf16.msra.mxu1 %v932_v60  ;;  %v950_v38 = vld [vmem:[#allocation6 + $0x60] ss:$8 sps:$4 sm:$0xff]  }
 0x138   :  { %656 = vmatprep.subr.bf16.mxu1 %v937_v62 }
 0x13b   :  { %657 = vmatpush1.bf16.msra.mxu1 %v935_v63 }
 0x13c   :  { %658 = vmatprep.subr.bf16.mxu1 %v940_v0 }
 0x13f   :  { %659 = vmatpush1.bf16.msra.mxu1 %v938_v1 }
 0x140   :  { %660 = vmatprep.subr.bf16.mxu1 %v943_v2 }
 0x143   :  { %661 = vmatpush1.bf16.msra.mxu1 %v941_v3 }
 0x144   :  { %662 = vmatprep.subr.bf16.mxu1 %v946_v4 }
 0x147   :  { %663 = vmatpush1.bf16.msra.mxu1 %v944_v5 }
 0x148   :  { %664 = vmatprep.subr.bf16.mxu1 %v949_v6 }
 0x14b   :  { %665 = vmatpush1.bf16.msra.mxu1 %v947_v7 }
 0x14c   :  { %666 = vmatprep.subr.bf16.mxu1 %v952_v37 }
 0x14f   :  { %667 = vmatpush1.bf16.msra.mxu1 %v950_v38 }
 0x150   :  { %668 = vmatprep.subr.bf16.mxu1 %v955_v39 }
 0x153   :  { %669 = vmatpush1.bf16.msra.mxu1 %v953_v40 }
 0x209   :  { %v407_v15 = vpop.f32.mrb[0].mxu1 }
 0x20a   :  { %v408_v16 = vadd.f32 %v407_v15, %v286_v13  ;;  %v409_v17 = vpop.f32.mrb[1].mxu1 }
 0x20b   :  { %v410_v18 = vadd.f32 %v409_v17, %v290_v14  ;;  %v411_v19 = vpop.f32.mrb[2].mxu1 }
 0x20c   :  { %735 = vst [vmem:[%s1243_s11] sm:$0xff] %v408_v16  ;;  %v412_v20 = vadd.f32 %v411_v19, %v286_v13  ;;  %v413_v21 = vpop.f32.mrb[3].mxu1 }
 0x20d   :  { %v416_v22 = vmul.f32 0.5, %v410_v18  ;;  %737 = vst [vmem:[%s1244_s12] sm:$0xff] %v410_v18  ;;  %v414_v23 = vadd.f32 %v413_v21, %v290_v14 }
 0x20e   :  { %736 = vst [vmem:[%s1243_s11 + $0x8] sm:$0xff] %v412_v20 }
 0x20f   :  { %v418_v24 = vmul.f32 1.442695, %v416_v22  ;;  %v417_v25 = vmul.f32 0.5, %v414_v23  ;;  %738 = vst [vmem:[%s1244_s12 + $0x8] sm:$0xff] %v414_v23 }
 0x211   :  { %956 = vpow2.f32 %v418_v24  ;;  %v420_v26 = vmul.f32 1.442695, %v417_v25 }
 0x213   :  { %958 = vpow2.f32 %v420_v26 }
 0x21b   :  { %v957_v30 = vpop.eup %956 }
 0x21c   :  { %v426_v31 = vmul.f32 %v957_v30, %v821_v28 }
 0x21d   :  { %v959_v32 = vpop.eup %958 }
 0x21e   :  { %v427_v33 = vmul.f32 %v959_v32, %v822_v29  ;;  %v428_v34 = vadd.f32 %v426_v31, %v408_v16 }
 0x220   :  { %v429_v35 = vadd.f32 %v427_v33, %v412_v20 }
 0x222   :  { %v430_v36 = vpack.c.bf16 %v429_v35, %v428_v34 }
 0x224   :  { %871 = vmatmul.mubr.bf16.vlgmr.msra.gmra.mrb[4].mxu0 %v430_v36 }
 0x2f7   :  { %v536_v42 = vpop.f32.mrb[4].mxu0 }
 0x2f8   :  { %v537_v43 = vadd.f32 %v786_v41, %v536_v42  ;;  %v872_v44 = vpop.f32.mrb[5].mxu0 }
 0x2f9   :  { %v539_v45 = vpop.f32.mrb[6].mxu0 }
 0x2fa   :  { %v540_v46 = vadd.f32 %v786_v41, %v539_v45  ;;  %v873_v47 = vpop.f32.mrb[7].mxu0  ;;  %v543_v48 = vmax.f32 %v537_v43, 0.0 }
 0x2fc   :  { %v544_v49 = vmax.f32 %v540_v46, 0.0 }
 0x2fe   :  { %v545_v50 = vpack.c.bf16 %v544_v49, %v543_v48 }
 0x300   :  { %687 = vmatmul.mubr.bf16.vlgmr.msra.gmra.mrb[4].mxu1 %v545_v50 }
 0x3d3   :  { %v688_v54 = vpop.f32.mrb[4].mxu1 }
 0x3d4   :  { %v689_v55 = vadd.f32 %v688_v54, %v567_v52  ;;  %v690_v56 = vpop.f32.mrb[5].mxu1 }
 0x3d5   :  { %v691_v57 = vadd.f32 %v690_v56, %v571_v53  ;;  %v692_v58 = vpop.f32.mrb[6].mxu1 }
 0x3d6   :  { %v811_v59 = vmul.f32 -1.442695, %v689_v55  ;;  %v693_v60 = vadd.f32 %v692_v58, %v567_v52  ;;  %v694_v61 = vpop.f32.mrb[7].mxu1 }
 0x3d7   :  { %v812_v62 = vmul.f32 -1.442695, %v691_v57  ;;  %v695_v63 = vadd.f32 %v694_v61, %v571_v53 }
 0x3d8   :  { %960 = vpow2.f32 %v811_v59  ;;  %v813_v0 = vmul.f32 -1.442695, %v693_v60 }
 0x3d9   :  { %962 = vpow2.f32 %v812_v62  ;;  %v814_v1 = vmul.f32 -1.442695, %v695_v63 }
 0x3da   :  { %964 = vpow2.f32 %v813_v0 }
 0x3db   :  { %966 = vpow2.f32 %v814_v1 }
 0x3e2   :  { %v961_v2 = vpop.eup %960 }
 0x3e3   :  { %v963_v3 = vpop.eup %962  ;;  %v709_v4 = vadd.f32 1.0, %v961_v2 }
 0x3e4   :  { %v965_v5 = vpop.eup %964  ;;  %v710_v6 = vadd.f32 1.0, %v963_v3 }
 0x3e5   :  { %v967_v7 = vpop.eup %966  ;;  %968 = vrcp.f32 %v709_v4  ;;  %v711_v8 = vadd.f32 1.0, %v965_v5 }
 0x3e6   :  { %970 = vrcp.f32 %v710_v6  ;;  %v712_v9 = vadd.f32 1.0, %v967_v7 }
 0x3e7   :  { %972 = vrcp.f32 %v711_v8 }
 0x3e8   :  { %974 = vrcp.f32 %v712_v9 }
 0x3ef   :  { %v969_v10 = vpop.eup %968 }
 0x3f0   :  { %v971_v11 = vpop.eup %970 }
 0x3f1   :  { %v973_v12 = vpop.eup %972  ;;  %v817_v13 = vpack.c.bf16 %v971_v11, %v969_v10 }
 0x3f2   :  { %v975_v14 = vpop.eup %974 }
 0x3f3   :  { %733 = vst [vmem:[%s1242_s10] sm:$0xff] %v817_v13  ;;  %v818_v15 = vpack.c.bf16 %v975_v14, %v973_v12 }
 0x3f5   :  { %734 = vst [vmem:[%s1242_s10 + $0x8] sm:$0xff] %v818_v15 }
 0x3f6   :  { %751 = vsyncpa [#allocation3], 1 }
 0x3f7   :  { %752 = vsyncpa [#allocation5], 1 }

</bundles_post_ra>
